<compile_context>
chip_gen: v6e
topology: v6e:2x2x1
jax: 0.10.0
libtpu: 0.0.40
codegen_flags: <defaults>
</compile_context>

<pallas_src>
import functools

import jax
import jax.numpy as jnp
from jax.experimental import pallas as pl
from jax.experimental.pallas import tpu as pltpu

F32 = jnp.float32
BF16 = jnp.bfloat16


def _compute_vmem_limit():
    """Per-generation scoped VMEM budget: 3/4 of physical, capped at 96 MiB."""
    default = 32 * 1024 * 1024
    try:
        info_fn = getattr(pltpu, "get_tpu_info", None)
        if info_fn is None:
            return default
        phys = getattr(info_fn(), "vmem_capacity_bytes", None)
        if not phys:
            return default
        return int(min(phys * 3 // 4, 96 * 1024 * 1024))
    except Exception:
        return default


_VMEM_LIMIT = _compute_vmem_limit()


def _choose_tile(dim, target, align):
    """Largest divisor of `dim` that is <= target and a multiple of `align`.
    Falls back to the full dim (always layout-legal: block == full array dim)."""
    if dim <= target:
        return dim
    t = (target // align) * align
    while t >= align:
        if dim % t == 0:
            return t
        t -= align
    return dim


def _shrink_sublane_tile(dim, tile, min_blocks=2):
    """Best-effort: pick a smaller sublane-aligned divisor so dim//tile >=
    min_blocks (keeps a non-degenerate parallel axis for v7x megacore)."""
    if dim // tile >= min_blocks:
        return tile
    t = (dim // min_blocks) // 8 * 8
    while t >= 8:
        if dim % t == 0:
            return t
        t -= 8
    return tile


# ----------------------------------------------------------------------------
# Full-K tiled matmul + bias (+ elementwise activation).  No accumulator.
# ----------------------------------------------------------------------------
def _mm_kernel(x_ref, w_ref, b_ref, o_ref, *, act):
    y = jnp.dot(x_ref[...], w_ref[...], preferred_element_type=jnp.float32)
    y = y + b_ref[...]
    if act == "gelu":
        # TODO(synk): HF BERT uses exact erf-GELU; tanh approximation kept for
        # robust Mosaic lowering (small numerical drift).
        c = 0.7978845608028654  # sqrt(2/pi)
        y = 0.5 * y * (1.0 + jnp.tanh(c * (y + 0.044715 * y * y * y)))
    elif act == "tanh":
        y = jnp.tanh(y)
    o_ref[...] = y.astype(o_ref.dtype)


def matmul_bias(x, w, b, act=None, out_dtype=F32, tm=512, tn=512):
    M, K = x.shape
    N = w.shape[1]
    tm = _choose_tile(M, tm, 8)
    tn = _choose_tile(N, tn, 128)
    if M // tm == 1 and N // tn == 1:
        tm = _shrink_sublane_tile(M, tm)
    # TODO(synk): for K too large to hold a full-K tile under the VMEM budget,
    # reintroduce a k grid axis with an f32 VMEM accumulator (not needed for
    # BERT-base/large shapes, which fit in <=~20 MiB double-buffered).
    return pl.pallas_call(
        functools.partial(_mm_kernel, act=act),
        grid=(M // tm, N // tn),
        in_specs=[
            pl.BlockSpec((tm, K), lambda i, j: (i, 0)),
            pl.BlockSpec((K, tn), lambda i, j: (0, j)),
            pl.BlockSpec((1, tn), lambda i, j: (0, j)),
        ],
        out_specs=pl.BlockSpec((tm, tn), lambda i, j: (i, j)),
        out_shape=jax.ShapeDtypeStruct((M, N), out_dtype),
        compiler_params=pltpu.CompilerParams(
            dimension_semantics=("parallel", "parallel"),
            vmem_limit_bytes=_VMEM_LIMIT),
    )(x.astype(BF16), w.astype(BF16), b.reshape(1, N).astype(F32))


# ----------------------------------------------------------------------------
# Full-K matmul + bias + residual add + LayerNorm (fused epilogue).  N = full H.
# ----------------------------------------------------------------------------
def _mm_res_ln_kernel(x_ref, w_ref, b_ref, r_ref, g_ref, bt_ref, o_ref, *, eps):
    y = jnp.dot(x_ref[...], w_ref[...], preferred_element_type=jnp.float32)
    y = y + b_ref[...] + r_ref[...].astype(jnp.float32)
    mu = jnp.mean(y, axis=-1, keepdims=True)
    yc = y - mu
    var = jnp.mean(yc * yc, axis=-1, keepdims=True)
    o_ref[...] = (yc * jax.lax.rsqrt(var + eps) * g_ref[...]
                  + bt_ref[...]).astype(o_ref.dtype)


def matmul_bias_res_ln(x, w, b, residual, gamma, beta, eps=1e-12,
                       out_dtype=BF16, tm=512):
    M, K = x.shape
    N = w.shape[1]
    tm = _choose_tile(M, tm, 8)
    if M // tm == 1:
        tm = _shrink_sublane_tile(M, tm)
    return pl.pallas_call(
        functools.partial(_mm_res_ln_kernel, eps=eps),
        grid=(M // tm,),
        in_specs=[
            pl.BlockSpec((tm, K), lambda i: (i, 0)),
            pl.BlockSpec((K, N), lambda i: (0, 0)),
            pl.BlockSpec((1, N), lambda i: (0, 0)),
            pl.BlockSpec((tm, N), lambda i: (i, 0)),
            pl.BlockSpec((1, N), lambda i: (0, 0)),
            pl.BlockSpec((1, N), lambda i: (0, 0)),
        ],
        out_specs=pl.BlockSpec((tm, N), lambda i: (i, 0)),
        out_shape=jax.ShapeDtypeStruct((M, N), out_dtype),
        compiler_params=pltpu.CompilerParams(
            dimension_semantics=("parallel",),
            vmem_limit_bytes=_VMEM_LIMIT),
    )(x.astype(BF16), w.astype(BF16), b.reshape(1, N).astype(F32),
      residual.astype(BF16), gamma.reshape(1, N).astype(F32),
      beta.reshape(1, N).astype(F32))


# ----------------------------------------------------------------------------
# Embeddings: word-emb (gathered in plain JAX) + position + type adds fused
# with the embedding LayerNorm — the (B,S,H) sum never hits HBM.
# ----------------------------------------------------------------------------
def _emb_ln_kernel(we_ref, pos_ref, typ_ref, g_ref, b_ref, o_ref, *, eps):
    x = we_ref[0] + pos_ref[...] + typ_ref[...]
    mu = jnp.mean(x, axis=-1, keepdims=True)
    xc = x - mu
    var = jnp.mean(xc * xc, axis=-1, keepdims=True)
    o_ref[0] = (xc * jax.lax.rsqrt(var + eps) * g_ref[...]
                + b_ref[...]).astype(o_ref.dtype)


def embed_layernorm(word_gathered, pos_slice, type_row, gamma, beta,
                    eps=1e-12, out_dtype=BF16):
    B, S, H = word_gathered.shape
    return pl.pallas_call(
        functools.partial(_emb_ln_kernel, eps=eps),
        grid=(B,),
        in_specs=[
            pl.BlockSpec((1, S, H), lambda b: (b, 0, 0)),
            pl.BlockSpec((S, H), lambda b: (0, 0)),
            pl.BlockSpec((1, H), lambda b: (0, 0)),
            pl.BlockSpec((1, H), lambda b: (0, 0)),
            pl.BlockSpec((1, H), lambda b: (0, 0)),
        ],
        out_specs=pl.BlockSpec((1, S, H), lambda b: (b, 0, 0)),
        out_shape=jax.ShapeDtypeStruct((B, S, H), out_dtype),
        compiler_params=pltpu.CompilerParams(
            dimension_semantics=("parallel",),
            vmem_limit_bytes=_VMEM_LIMIT),
    )(word_gathered.astype(F32), pos_slice.astype(F32), type_row.astype(F32),
      gamma.reshape(1, H).astype(F32), beta.reshape(1, H).astype(F32))


# ----------------------------------------------------------------------------
# Attention: grid over (batch, head); heads sliced via BlockSpec index maps
# directly from the fused (B, S, 3H) QKV tensor; (B,1,S) additive mask
# broadcast inside the kernel; context written back in (B, S, H) layout.
# Probs output is optional and stored in bf16.
# ----------------------------------------------------------------------------
def _attention_kernel(q_ref, k_ref, v_ref, m_ref, o_ref, *p_refs, scale,
                      out_probs):
    q = q_ref[0] * scale               # fold 1/sqrt(dh) into q (S*dh muls)
    k = k_ref[0]
    v = v_ref[0]
    s = jax.lax.dot_general(q, k, (((1,), (1,)), ((), ())),
                            preferred_element_type=jnp.float32)   # q @ k^T
    s = s + m_ref[0]                   # (1, S) mask broadcasts over query rows
    s = s - jnp.max(s, axis=-1, keepdims=True)
    e = jnp.exp(s)
    # exact division so exported probs sum to 1 (they also feed the context).
    # TODO(synk): on v6e/v7x a bf16 exp would roughly double EUP throughput.
    p = e / jnp.sum(e, axis=-1, keepdims=True)
    if out_probs:
        p_refs[0][0, 0] = p.astype(p_refs[0].dtype)
    ctx = jnp.dot(p.astype(v.dtype), v, preferred_element_type=jnp.float32)
    o_ref[0] = ctx.astype(o_ref.dtype)


def attention(qkv, mask_add, heads, dh, out_dtype=BF16, probs_dtype=BF16,
              output_attentions=True):
    B, S, threeH = qkv.shape
    H = threeH // 3
    assert H == heads * dh
    # TODO(synk): for dh < 128 (e.g. BERT-base dh=64) pack >=2 heads per block
    # so the lane dim stays 128-aligned; demo uses dh=128.
    # TODO(synk): for long sequences, tile queries (flash-style running
    # max/sum) instead of one (S, S) score block per head.
    scale = 1.0 / float(dh) ** 0.5

    in_specs = [
        pl.BlockSpec((1, S, dh), lambda b, h: (b, 0, h)),
        pl.BlockSpec((1, S, dh), lambda b, h: (b, 0, heads + h)),
        pl.BlockSpec((1, S, dh), lambda b, h: (b, 0, 2 * heads + h)),
        pl.BlockSpec((1, 1, S), lambda b, h: (b, 0, 0)),
    ]
    ctx_spec = pl.BlockSpec((1, S, dh), lambda b, h: (b, 0, h))
    ctx_shape = jax.ShapeDtypeStruct((B, S, H), out_dtype)
    cp = pltpu.CompilerParams(dimension_semantics=("parallel", "parallel"),
                              vmem_limit_bytes=_VMEM_LIMIT)
    kernel = functools.partial(_attention_kernel, scale=scale,
                               out_probs=output_attentions)
    if output_attentions:
        probs_spec = pl.BlockSpec((1, 1, S, S), lambda b, h: (b, h, 0, 0))
        probs_shape = jax.ShapeDtypeStruct((B, heads, S, S), probs_dtype)
        ctx, probs = pl.pallas_call(
            kernel, grid=(B, heads), in_specs=in_specs,
            out_specs=(ctx_spec, probs_spec),
            out_shape=(ctx_shape, probs_shape),
            compiler_params=cp)(qkv, qkv, qkv, mask_add)
        return ctx, probs
    ctx = pl.pallas_call(
        kernel, grid=(B, heads), in_specs=in_specs,
        out_specs=ctx_spec, out_shape=ctx_shape,
        compiler_params=cp)(qkv, qkv, qkv, mask_add)
    return ctx, None


# ----------------------------------------------------------------------------
# Fused Linear(H+2 -> 1) scoring + grouped log-softmax + WER-weighted KL loss
# ----------------------------------------------------------------------------
def _score_loss_kernel(f_ref, w_ref, b_ref, l_ref, wer_ref, s_ref, loss_ref,
                       *, denom, use_wers, compute_loss):
    scores = jnp.sum(f_ref[...] * w_ref[...], axis=-1) + b_ref[...]   # (U, N)
    s_ref[...] = scores
    if compute_loss:
        m = jnp.max(scores, axis=-1, keepdims=True)
        sh = scores - m
        log_p = sh - jnp.log(jnp.sum(jnp.exp(sh), axis=-1, keepdims=True))
        labels = l_ref[...]
        safe = jnp.where(labels > 0, labels, 1.0)        # xlogy: 0*log(0) -> 0
        per = jnp.where(labels > 0, labels * (jnp.log(safe) - log_p), 0.0)
        if use_wers:
            per = per * (wer_ref[...] * 5.0 + 0.5)
        loss_ref[0, 0] = jnp.sum(per) / denom
    else:
        loss_ref[0, 0] = 0.0
    # TODO(synk): present scores as a lane-dense (1, U*nbest) slab and write the
    # scalar loss to SMEM if U grows large (lane-sparse-store penalty).


def score_and_kl_loss(feats, w, b, labels, wers, *, denom, use_wers,
                      compute_loss):
    U, N, Hp2 = feats.shape
    scores, loss = pl.pallas_call(
        functools.partial(_score_loss_kernel, denom=float(denom),
                          use_wers=use_wers, compute_loss=compute_loss),
        grid=(1,),
        in_specs=[
            pl.BlockSpec((U, N, Hp2), lambda i: (0, 0, 0)),
            pl.BlockSpec((1, 1, Hp2), lambda i: (0, 0, 0)),
            pl.BlockSpec((1, 1), lambda i: (0, 0)),
            pl.BlockSpec((U, N), lambda i: (0, 0)),
            pl.BlockSpec((U, N), lambda i: (0, 0)),
        ],
        out_specs=(
            pl.BlockSpec((U, N), lambda i: (0, 0)),
            pl.BlockSpec((1, 1), lambda i: (0, 0)),
        ),
        out_shape=(
            jax.ShapeDtypeStruct((U, N), F32),
            jax.ShapeDtypeStruct((1, 1), F32),
        ),
        compiler_params=pltpu.CompilerParams(
            dimension_semantics=("arbitrary",),
            vmem_limit_bytes=_VMEM_LIMIT),
    )(feats.astype(F32), w.reshape(1, 1, Hp2).astype(F32),
      b.reshape(1, 1).astype(F32), labels.astype(F32), wers.astype(F32))
    return scores, loss[0, 0]


# ----------------------------------------------------------------------------
# Mini-BERT parameters (deterministic synthetic init; shapes mirror the module)
# ----------------------------------------------------------------------------
def init_params(key, vocab, H, heads, inter, layers, max_pos):
    def nrm(k, shape, scale=0.02, dtype=BF16):
        return (scale * jax.random.normal(k, shape, dtype=F32)).astype(dtype)

    keys = iter(jax.random.split(key, 16 + 8 * layers))
    p = {
        "num_heads": heads,
        "word_emb": nrm(next(keys), (vocab, H), dtype=F32),
        "pos_emb": nrm(next(keys), (max_pos, H), dtype=F32),
        "type_emb": nrm(next(keys), (2, H), dtype=F32),
        "emb_ln_g": jnp.ones((H,), F32),
        "emb_ln_b": jnp.zeros((H,), F32),
        "layers": [],
        "Wp": nrm(next(keys), (H, H)),                  # pooler dense (bf16)
        "bp": jnp.zeros((H,), F32),
        "W_lin": nrm(next(keys), (H + 2,), dtype=F32),  # Linear(770, 1) analogue
        "b_lin": jnp.zeros((1,), F32),
    }
    for _ in range(layers):
        lp = {
            "Wqkv": nrm(next(keys), (H, 3 * H)),        # fused Q|K|V projection
            "bqkv": jnp.zeros((3 * H,), F32),
            "Wo": nrm(next(keys), (H, H)), "bo": jnp.zeros((H,), F32),
            "ln1_g": jnp.ones((H,), F32), "ln1_b": jnp.zeros((H,), F32),
            "W1": nrm(next(keys), (H, inter)), "b1": jnp.zeros((inter,), F32),
            "W2": nrm(next(keys), (inter, H)), "b2": jnp.zeros((H,), F32),
            "ln2_g": jnp.ones((H,), F32), "ln2_b": jnp.zeros((H,), F32),
        }
        p["layers"].append(lp)
    return p


# ----------------------------------------------------------------------------
# pBert forward
# ----------------------------------------------------------------------------
def pbert_forward(params, input_ids, attention_mask, am_score, ctc_score,
                  labels=None, wers=None, nbest=4, output_attentions=True):
    B, S = input_ids.shape
    H = params["word_emb"].shape[1]
    heads = params["num_heads"]
    dh = H // heads
    M = B * S

    # --- embeddings: gather in plain JAX; pos/type adds + LN fused in Pallas --
    we = params["word_emb"][input_ids]                        # (B, S, H) gather
    x2 = embed_layernorm(we, params["pos_emb"][:S], params["type_emb"][0:1],
                         params["emb_ln_g"], params["emb_ln_b"]).reshape(M, H)

    # additive mask stays (B, 1, S); broadcast over heads/queries in-kernel
    mask_add = ((1.0 - attention_mask.astype(F32)) * (-1e9)).reshape(B, 1, S)

    attentions = []
    for lp in params["layers"]:
        qkv = matmul_bias(x2, lp["Wqkv"], lp["bqkv"], out_dtype=BF16)   # (M,3H)
        ctx, probs = attention(qkv.reshape(B, S, 3 * H), mask_add, heads, dh,
                               output_attentions=output_attentions)
        if output_attentions:
            attentions.append(probs)                          # (B, heads, S, S)
        x2 = matmul_bias_res_ln(ctx.reshape(M, H), lp["Wo"], lp["bo"],
                                x2, lp["ln1_g"], lp["ln1_b"])
        ffn = matmul_bias(x2, lp["W1"], lp["b1"], act="gelu", out_dtype=BF16)
        x2 = matmul_bias_res_ln(ffn, lp["W2"], lp["b2"],
                                x2, lp["ln2_g"], lp["ln2_b"])

    # --- pooler: tanh(dense(CLS)) ---
    cls = x2.reshape(B, S, H)[:, 0, :]                        # (B, H)
    pooled = matmul_bias(cls, params["Wp"], params["bp"], act="tanh",
                         out_dtype=F32)

    # --- cat([pooler, am, ctc]) ; Linear(H+2, 1) ; grouped softmax + KL loss --
    feats = jnp.concatenate([pooled, am_score.astype(F32),
                             ctc_score.astype(F32)], axis=-1)  # (B, H+2)
    U = B // nbest
    use_wers = wers is not None
    compute_loss = labels is not None
    labels_g = (labels.reshape(U, nbest).astype(F32) if compute_loss
                else jnp.zeros((U, nbest), F32))
    wers_g = (wers.reshape(U, nbest).astype(F32) if use_wers
              else jnp.zeros((U, nbest), F32))
    scores_g, loss = score_and_kl_loss(
        feats.reshape(U, nbest, H + 2), params["W_lin"], params["b_lin"],
        labels_g, wers_g, denom=B, use_wers=use_wers, compute_loss=compute_loss)
    final_score = jax.lax.stop_gradient(scores_g.reshape(B))  # .clone().detach()
    # TODO(synk): hardLabel / non-'KL' loss branches not wired (same grouped
    # softmax kernel with log_score=False would be reused).

    return {"loss": loss if compute_loss else None,
            "score": final_score,
            "attention_weight": tuple(attentions)}


# ----------------------------------------------------------------------------
if __name__ == "__main__":
    key = jax.random.PRNGKey(0)
    k_par, k_ids, k_am, k_ctc, k_lab, k_wer = jax.random.split(key, 6)

    # small shapes: 2 utterances x 4-best = 8 hypotheses, seq 8, hidden 256
    # (2 heads -> head_dim 128, lane-aligned)
    U, NBEST, S = 2, 4, 8
    B = U * NBEST
    H, HEADS, INTER, LAYERS, VOCAB, MAXPOS = 256, 2, 1024, 2, 128, 32

    params = init_params(k_par, VOCAB, H, HEADS, INTER, LAYERS, MAXPOS)

    input_ids = jax.random.randint(k_ids, (B, S), 0, VOCAB, dtype=jnp.int32)
    # mask out the last two tokens of the odd hypotheses
    lengths = jnp.where(jnp.arange(B) % 2 == 0, S, S - 2)
    attention_mask = (jnp.arange(S)[None, :] < lengths[:, None]).astype(jnp.int32)
    am_score = jax.random.normal(k_am, (B, 1), dtype=F32)
    ctc_score = jax.random.normal(k_ctc, (B, 1), dtype=F32)
    labels = jax.nn.softmax(jax.random.normal(k_lab, (U, NBEST)), axis=-1).reshape(B)
    wers = jax.random.uniform(k_wer, (B,), dtype=F32)

    out = pbert_forward(params, input_ids, attention_mask, am_score, ctc_score,
                        labels=labels, wers=wers, nbest=NBEST,
                        output_attentions=True)
    jax.block_until_ready((out["loss"], out["score"], out["attention_weight"]))
    assert out["score"].shape == (B,)
    assert len(out["attention_weight"]) == LAYERS
    assert out["attention_weight"][0].shape == (B, HEADS, S, S)
    assert bool(jnp.isfinite(out["loss"]))
    print("KERNEL_OK")
</pallas_src>

<mosaic_0001>
module attributes {stable_mosaic.version = 11 : i64} {
  func.func @_emb_ln_kernel(%arg0: i32, %arg1: memref<1x8x256xf32, #tpu.memory_space<vmem>>, %arg2: memref<8x256xf32, #tpu.memory_space<vmem>>, %arg3: memref<1x256xf32, #tpu.memory_space<vmem>>, %arg4: memref<1x256xf32, #tpu.memory_space<vmem>>, %arg5: memref<1x256xf32, #tpu.memory_space<vmem>>, %arg6: memref<1x8x256xbf16, #tpu.memory_space<vmem>>) attributes {dimension_semantics = [#tpu.dimension_semantics<parallel>], iteration_bounds = array<i64: 8>, scalar_prefetch = 0 : i64, scratch_operands = 0 : i64, tpu.core_type = #tpu.core_type<tc>, window_params = [{transform_indices = @transform_0, window_bounds = array<i64: 1, 8, 256>}, {pipeline_mode = #tpu.pipeline_mode<synchronous>, transform_indices = @transform_1, window_bounds = array<i64: 8, 256>}, {pipeline_mode = #tpu.pipeline_mode<synchronous>, transform_indices = @transform_2, window_bounds = array<i64: 1, 256>}, {pipeline_mode = #tpu.pipeline_mode<synchronous>, transform_indices = @transform_3, window_bounds = array<i64: 1, 256>}, {pipeline_mode = #tpu.pipeline_mode<synchronous>, transform_indices = @transform_4, window_bounds = array<i64: 1, 256>}, {transform_indices = @transform_5, window_bounds = array<i64: 1, 8, 256>}]} {
    %c0 = arith.constant 0 : index
    %c0_0 = arith.constant 0 : index
    %c0_1 = arith.constant 0 : index
    %0 = vector.load %arg1[%c0, %c0_0, %c0_1] : memref<1x8x256xf32, #tpu.memory_space<vmem>>, vector<1x8x256xf32>
    %1 = vector.shape_cast %0 : vector<1x8x256xf32> to vector<8x256xf32>
    %c0_2 = arith.constant 0 : index
    %c0_3 = arith.constant 0 : index
    %2 = vector.load %arg2[%c0_2, %c0_3] : memref<8x256xf32, #tpu.memory_space<vmem>>, vector<8x256xf32>
    %3 = arith.addf %1, %2 : vector<8x256xf32>
    %c0_4 = arith.constant 0 : index
    %c0_5 = arith.constant 0 : index
    %4 = vector.load %arg3[%c0_4, %c0_5] : memref<1x256xf32, #tpu.memory_space<vmem>>, vector<1x256xf32>
    %5 = vector.broadcast %4 : vector<1x256xf32> to vector<8x256xf32>
    %6 = arith.addf %3, %5 : vector<8x256xf32>
    %cst = arith.constant dense<0.000000e+00> : vector<8xf32>
    %7 = vector.multi_reduction <add>, %6, %cst [1] : vector<8x256xf32> to vector<8xf32>
    %8 = vector.shape_cast %7 : vector<8xf32> to vector<8x1xf32>
    %cst_6 = arith.constant 2.560000e+02 : f32
    %9 = vector.broadcast %cst_6 : f32 to vector<8x1xf32>
    %10 = arith.divf %8, %9 : vector<8x1xf32>
    %11 = vector.broadcast %10 : vector<8x1xf32> to vector<8x256xf32>
    %12 = arith.subf %6, %11 : vector<8x256xf32>
    %13 = arith.mulf %12, %12 : vector<8x256xf32>
    %cst_7 = arith.constant dense<0.000000e+00> : vector<8xf32>
    %14 = vector.multi_reduction <add>, %13, %cst_7 [1] : vector<8x256xf32> to vector<8xf32>
    %15 = vector.shape_cast %14 : vector<8xf32> to vector<8x1xf32>
    %cst_8 = arith.constant 2.560000e+02 : f32
    %16 = vector.broadcast %cst_8 : f32 to vector<8x1xf32>
    %17 = arith.divf %15, %16 : vector<8x1xf32>
    %cst_9 = arith.constant 9.99999996E-13 : f32
    %18 = vector.broadcast %cst_9 : f32 to vector<8x1xf32>
    %19 = arith.addf %17, %18 : vector<8x1xf32>
    %20 = math.rsqrt %19 : vector<8x1xf32>
    %21 = vector.broadcast %20 : vector<8x1xf32> to vector<8x256xf32>
    %22 = arith.mulf %12, %21 : vector<8x256xf32>
    %c0_10 = arith.constant 0 : index
    %c0_11 = arith.constant 0 : index
    %23 = vector.load %arg4[%c0_10, %c0_11] : memref<1x256xf32, #tpu.memory_space<vmem>>, vector<1x256xf32>
    %24 = vector.broadcast %23 : vector<1x256xf32> to vector<8x256xf32>
    %25 = arith.mulf %22, %24 : vector<8x256xf32>
    %c0_12 = arith.constant 0 : index
    %c0_13 = arith.constant 0 : index
    %26 = vector.load %arg5[%c0_12, %c0_13] : memref<1x256xf32, #tpu.memory_space<vmem>>, vector<1x256xf32>
    %27 = vector.broadcast %26 : vector<1x256xf32> to vector<8x256xf32>
    %28 = arith.addf %25, %27 : vector<8x256xf32>
    %29 = arith.truncf %28 : vector<8x256xf32> to vector<8x256xbf16>
    %c0_14 = arith.constant 0 : index
    %c0_15 = arith.constant 0 : index
    %c0_16 = arith.constant 0 : index
    %30 = vector.load %arg6[%c0_14, %c0_15, %c0_16] : memref<1x8x256xbf16, #tpu.memory_space<vmem>>, vector<1x8x256xbf16>
    %31 = vector.shape_cast %30 : vector<1x8x256xbf16> to vector<8x256xbf16>
    %32 = vector.shape_cast %29 : vector<8x256xbf16> to vector<1x8x256xbf16>
    tpu.vector_store %arg6[%c0_14, %c0_15, %c0_16], %32 {strides = array<i32>} : memref<1x8x256xbf16, #tpu.memory_space<vmem>>, vector<1x8x256xbf16>,
    return
  }
  func.func @transform_0(%arg0: i32) -> (i32, i32, i32) {
    %c0_i32 = arith.constant 0 : i32
    %c0_i32_0 = arith.constant 0 : i32
    %c0_i32_1 = arith.constant 0 : i32
    return %arg0, %c0_i32, %c0_i32_0 : i32, i32, i32
  }
  func.func @transform_1(%arg0: i32) -> (i32, i32) {
    %c0_i32 = arith.constant 0 : i32
    %c0_i32_0 = arith.constant 0 : i32
    %c0_i32_1 = arith.constant 0 : i32
    return %c0_i32, %c0_i32_0 : i32, i32
  }
  func.func @transform_2(%arg0: i32) -> (i32, i32) {
    %c0_i32 = arith.constant 0 : i32
    %c0_i32_0 = arith.constant 0 : i32
    %c0_i32_1 = arith.constant 0 : i32
    return %c0_i32, %c0_i32_0 : i32, i32
  }
  func.func @transform_3(%arg0: i32) -> (i32, i32) {
    %c0_i32 = arith.constant 0 : i32
    %c0_i32_0 = arith.constant 0 : i32
    %c0_i32_1 = arith.constant 0 : i32
    return %c0_i32, %c0_i32_0 : i32, i32
  }
  func.func @transform_4(%arg0: i32) -> (i32, i32) {
    %c0_i32 = arith.constant 0 : i32
    %c0_i32_0 = arith.constant 0 : i32
    %c0_i32_1 = arith.constant 0 : i32
    return %c0_i32, %c0_i32_0 : i32, i32
  }
  func.func @transform_5(%arg0: i32) -> (i32, i32, i32) {
    %c0_i32 = arith.constant 0 : i32
    %c0_i32_0 = arith.constant 0 : i32
    %c0_i32_1 = arith.constant 0 : i32
    return %arg0, %c0_i32, %c0_i32_0 : i32, i32, i32
  }
}

</mosaic_0001>

<bundles_post_ra>
// kernel: tpu_custom_call.1
= control target key start
LH: loop header
LB: loop body
LE: loop exit
PB: predicated region body
PF: predicated region fallthrough
CT: control target
= control target key end

     0   :  { %10 = vsyncpa [#allocation3], 0  ;;  %s833_s0 = inlined_call_operand.hbm [shape: f32[8,8,256], index: 0, kind: input, shape index: {}]   ;;  %s834_s1 = inlined_call_operand.hbm [shape: f32[8,256], index: 1, kind: input, shape index: {}]   ;;  %s835_s2 = inlined_call_operand.vmem [shape: f32[1,256], index: 2, kind: input, shape index: {}]   ;;  %s836_s3 = inlined_call_operand.vmem [shape: f32[1,256], index: 3, kind: input, shape index: {}]   ;;  %s837_s4 = inlined_call_operand.vmem [shape: f32[1,256], index: 4, kind: input, shape index: {}]   ;;  %s838_s5 = inlined_call_operand.hbm [shape: bf16[8,8,256], index: 5, kind: output, shape index: {}]  }
   0x1   :  { %12 = vsyncpa [#allocation3 + $0x1], 0 }
   0x2   :  { %13 = vsyncpa [#allocation6], 0 }
   0x3   :  { %14 = vsyncpa [#allocation4], 0 }
   0x4   :  { %16 = vsyncpa [#allocation4 + $0x1], 0  ;;  %s659_s18 = smov 0   ;;  %s661_s19 = smov 0  }
   0x5   :  { %s663_s20 = smov 0   ;;  %s665_s21 = smov 0  }
   0x6 LB: > { %s680_s22 = sadd.s32 4294967295, %s624_s21   ;;  %s423_s23 = sadd.s32 4294967294, %s624_s21   ;;  %s624_s21 = sphi %s665_s21, %s860_s21   ;;  %s620_s20 = sphi %s663_s20, %s859_s20   ;;  %s616_s19 = sphi %s661_s19, %s858_s19   ;;  %s612_s18 = sphi %s659_s18, %s857_s18  }
   0x7   : > { %p42_p0 = scmp.ne.s32.totalorder %s616_s19, %s612_s18  ;;  %p839_p1 = scmp.eq.s32.totalorder %s680_s22, 0 }
   0x8   : > { %p156_p3 = scmp.eq.s32.totalorder %s423_s23, 7  ;;  %p424_p5 = scmp.ge.s32.totalorder %s624_s21, 1 }
   0x9   : > { %p689_p4 = por %p839_p1, %p42_p0  ;;  %p163_p7 = scmp.lt.s32.totalorder %s624_s21, 9 }
   0xa   : > { %p694_p6 = por %p156_p3, %p42_p0  ;;  %s626_s27 = smov [#allocation5]  }
   0xb   : > { %s843_s24 = scalar_select %p689_p4, 1, 0 }
   0xc   : > { %s844_s25 = scalar_select %p694_p6, 1, 0 }
   0xd   : > { %p699_p8 = pnand %p424_p5, %p163_p7  ;;  %s176_s28 = sshll.u32 %s626_s27, 4  ;;  %s177_s28 = int_to_ptr.vmem [resolvable:$true] %s176_s28 }
   0xe   : > { %s706_s29 = sadd.s32 1, %s624_s21   ;;  %s29_s8 = sadd.s32 1, %s620_s20 }
   0xf   : > { %s845_s26 = scalar_select %p699_p8, 1, 0 }
  0x10   : > { %p451_p9 = pneg %p699_p8  ;;  %s26_s6 = ssub.s32 %s624_s21, %s706_s29 }
  0x11   : > { %p716_p11 = scmp.eq.s32.totalorder %s26_s6, 0  ;;  %p36_p12 = scmp.ne.s32.totalorder %s620_s20, %s616_s19 }
  0x12   : > { %p710_p10 = pnand %p451_p9, %p839_p1  ;;  %s513_s9 = scalar_lea.vmem %s177_s28, 256 }
  0x13   : > { %p514_p0 = scmp.ne.s32.totalorder %s177_s28, %s513_s9  ;;  %p521_p7 = scmp.lt.s32.totalorder %s177_s28, %s177_s28 }
  0x14   : > { %p504_p13 = pneg %p710_p10  ;;  %p522_p2 = scmp.lt.s32.totalorder %s513_s9, %s513_s9 }
  0x16   : > { %p516_p3 = pnand %p514_p0, %p504_p13  ;;  %p523_p9 = por %p522_p2, %p521_p7 }
  0x18   : > { %p517_p5 = pneg %p516_p3 }
  0x1a   : > { %p524_p1 = pnand %p523_p9, %p517_p5 }
  0x1c   : > { %527 = shalt.err (!%p524_p1)
}
  0x1d   : > { %454 = dma.hbm_to_vmem [thread:$0]  (!%p710_p10), %s834_s1, 256, %s177_s28, [#allocation6]  }
  0x1e   : > { %s733_s12 = scalar_select %p716_p11, %s620_s20, %s29_s8  }
  0x1f   : > { %p37_p1 = scmp.eq.s32.totalorder %s624_s21, 0  ;;  %p848_p2 = scmp.eq.s32.totalorder %s680_s22, 7 }
  0x20   : > { %p464_p0 = scmp.lt.s32.totalorder %s624_s21, 8  ;;  %s196_s14 = sand.u32 1, %s620_s20  }
  0x21   : > { %p741_p13 = por %p848_p2, %p36_p12  ;;  %p38_p3 = por %p37_p1, %p36_p12 }
  0x22   : > { %s427_s15 = sshll.u32 %s196_s14, 4  ;;  %s440_s16 = sshll.u32 %s624_s21, 8 }
  0x23   : > { %s849_s13 = scalar_select %p741_p13, 1, 0 }
  0x24   : > { %s754_s27 = scalar_lea.hbm %s833_s0, %s440_s16  ;;  %s200_s28 = scalar_lea.vmem [#allocation2], %s427_s15 }
  0x25   : > { %s208_s30 = sshll.u32 %s200_s28, 4  ;;  %p756_p10 = pnand %p464_p0, %p38_p3  ;;  %s209_s30 = int_to_ptr.vmem [resolvable:$true] %s208_s30 }
  0x26   : > { %s197_s7 = scalar_lea.sflag [#allocation3], %s196_s14  ;;  %s528_s8 = scalar_lea.hbm %s754_s27, 256 }
  0x27   : > { %p529_p11 = scmp.ne.s32.totalorder %s754_s27, %s528_s8  ;;  %p530_p12 = pneg %p756_p10 }
  0x28   : > { %s533_s11 = scalar_lea.hbm %s833_s0, 2048  ;;  %p534_p9 = scmp.lt.s32.totalorder %s754_s27, %s833_s0 }
  0x29   : > { %p531_p5 = pnand %p530_p12, %p529_p11  ;;  %p535_p1 = scmp.lt.s32.totalorder %s533_s11, %s528_s8 }
  0x2b   : > { %p532_p7 = pneg %p531_p5  ;;  %p536_p2 = por %p535_p1, %p534_p9 }
  0x2d   : > { %p537_p0 = pnand %p536_p2, %p532_p7 }
  0x2f   : > { %540 = shalt.err (!%p537_p0)
}
  0x30   : > { %s541_s17 = scalar_lea.vmem %s209_s30, 256  ;;  %s627_s14 = smov [#allocation2]  }
  0x31   : > { %p542_p3 = scmp.ne.s32.totalorder %s209_s30, %s541_s17  ;;  %s546_s23 = sshll.u32 %s627_s14, 4  ;;  %s547_s23 = int_to_ptr.vmem [resolvable:$false] %s546_s23 }
  0x32   : > { %s548_s28 = scalar_lea.vmem %s547_s23, 512  ;;  %p549_p11 = scmp.lt.s32.totalorder %s209_s30, %s547_s23 }
  0x33   : > { %p544_p6 = pnand %p542_p3, %p530_p12  ;;  %p550_p5 = scmp.lt.s32.totalorder %s548_s28, %s541_s17 }
  0x35   : > { %p545_p13 = pneg %p544_p6  ;;  %p551_p4 = por %p550_p5, %p549_p11 }
  0x37   : > { %p552_p8 = pnand %p551_p4, %p545_p13 }
  0x39   : > { %555 = shalt.err (!%p552_p8)
}
  0x3a   : > { %458 = dma.hbm_to_vmem [thread:$0]  (!%p756_p10), %s754_s27, 256, %s209_s30, %s197_s7  }
  0x3b   : > { %p851_p7 = scmp.ne.s32.totalorder %s845_s26, 0 }
  0x3c   : > { %s777_s8 = sand.u32 (!%p851_p7), 1, %s616_s19   ;;  %p852_p6 = scmp.ne.s32.totalorder (!%p851_p7), %s843_s24, 0 }
  0x3d   : > { %217 = sbr.rel (%p851_p7) target bundleno = 405 (0x195), region = 40  ;;  %s431_s9 = sshll.u32 (!%p851_p7), %s777_s8, 4 }
  0x3e   : > { %s220_s10 = scalar_lea.sflag (!%p851_p7), [#allocation3], %s777_s8  ;;  %s223_s11 = scalar_lea.vmem (!%p851_p7), [#allocation2], %s431_s9 }
  0x42   : > { %599 = dma.done.wait (%p852_p6), %s220_s10, 256  }
  0x43   : > { %601 = vsyncadd (%p852_p6), %s220_s10, 4294967040  ;;  %p853_p4 = scmp.eq.s32.totalorder %s680_s22, 0 }
  0x45   : > { %603 = dma.done.wait (%p853_p4), [#allocation6], 256   ;;  %p854_p8 = pmov %p853_p4 }
  0x46   : > { %v262_v0 = vlaneseq  ;;  %v254_v4 = vld [vmem:[%s223_s11] sm:$0xff]  ;;  %v255_v5 = vld [vmem:[%s223_s11 + $0x8] sm:$0xff]  ;;  %s433_s16 = sshll.u32 %s777_s8, 3  ;;  %s442_s15 = sshll.u32 %s680_s22, 7 }
  0x47   : > { %605 = vsyncadd (%p854_p8), [#allocation6], 4294967040  ;;  %v256_v6 = vld [vmem:[#allocation5] sm:$0xff]  ;;  %v257_v7 = vld [vmem:[#allocation5 + $0x8] sm:$0xff]  ;;  %s253_s17 = scalar_lea.vmem [#allocation7], %s433_s16  ;;  %s341_s9 = scalar_lea.hbm %s838_s5, %s442_s15 }
  0x48   : > { %v263_v1 = vshrl.u32 %v262_v0, 7  ;;  %v258_v8 = vadd.f32 %v256_v6, %v254_v4  ;;  %v260_v9 = vld [vmem:[%s835_s2] sm:$0x3]  ;;  %v259_v10 = vadd.f32 %v257_v7, %v255_v5  ;;  %s343_s14 = sshll.u32 %s253_s17, 4  ;;  %s329_s10 = scalar_lea.sflag [#allocation4], %s777_s8  ;;  %s344_s14 = int_to_ptr.vmem [resolvable:$true] %s343_s14 }
  0x49   : > { %v291_v26 = vld [vmem:[%s836_s3] sm:$0x3]  ;;  %s556_s11 = scalar_lea.vmem %s344_s14, 128  ;;  %p855_p10 = scmp.ne.s32.totalorder %s849_s13, 0 }
  0x4a   : > { %v264_v2 = vsub.s32 0, %v263_v1  ;;  %v268_v3 = vsub.s32 1, %v263_v1  ;;  %v305_v27 = vld [vmem:[%s837_s4] sm:$0x3]  ;;  %p557_p13 = scmp.ne.s32.totalorder %s344_s14, %s556_s11  ;;  %s628_s26 = smov [#allocation7]  }
  0x4b   : > { %s560_s27 = sshll.u32 %s628_s26, 4  ;;  %s561_s27 = int_to_ptr.vmem [resolvable:$false] %s560_s27 }
  0x4c   : > { %v265_v11 = vrot.slane %v260_v9, %v264_v2  ;;  %v269_v12 = vrot.slane %v260_v9, %v268_v3  ;;  %v296_v28 = vrot.slane %v291_v26, %v264_v2  ;;  %v300_v29 = vrot.slane %v291_v26, %v268_v3  ;;  %p558_p12 = pnand %p557_p13, %p855_p10  ;;  %s562_s22 = scalar_lea.vmem %s561_s27, 256 }
  0x4d   : > { %v310_v31 = vrot.slane %v305_v27, %v264_v2  ;;  %v314_v32 = vrot.slane %v305_v27, %v268_v3  ;;  %p563_p1 = scmp.lt.s32.totalorder %s344_s14, %s561_s27  ;;  %p564_p2 = scmp.lt.s32.totalorder %s562_s22, %s556_s11 }
  0x4e   : > { %v272_v13 = vadd.f32 %v265_v11, %v258_v8  ;;  %v273_v14 = vadd.f32 %v269_v12, %v259_v10  ;;  %p559_p9 = pneg %p558_p12 }
  0x4f   : > { %p565_p0 = por %p564_p2, %p563_p1 }
  0x50   : > { %v274_v15 = vadd.f32 %v273_v14, %v272_v13 }
  0x51   : > { %p566_p3 = pnand %p565_p0, %p559_p9 }
  0x52   : > { %275 = vadd.xlane.f32.xlu0 %v274_v15 }
  0xdb   : > { %v276_v16 = vpop.xlane.xlu0 %275 }
  0xdc   : > { %v278_v17 = vmul.f32 0.00390625, %v276_v16 }
  0xde   : > { %v279_v18 = vsub.f32 %v272_v13, %v278_v17  ;;  %v280_v19 = vsub.f32 %v273_v14, %v278_v17 }
  0xe0   : > { %v281_v20 = vmul.f32 %v279_v18, %v279_v18  ;;  %v282_v21 = vmul.f32 %v280_v19, %v280_v19 }
  0xe2   : > { %v283_v22 = vadd.f32 %v282_v21, %v281_v20 }
  0xe4   : > { %284 = vadd.xlane.f32.xlu0 %v283_v22 }
 0x16d   : > { %v285_v23 = vpop.xlane.xlu0 %284 }
 0x16e   : > { %v286_v24 = vmul.f32 0.00390625, %v285_v23 }
 0x170   : > { %v287_v25 = vadd.f32 1e-12, %v286_v24 }
 0x172   : > { %500 = vrsqrt.f32 %v287_v25 }
 0x17f   : > { %v501_v30 = vpop.eup %500 }
 0x180   : > { %v289_v33 = vmul.f32 %v501_v30, %v279_v18  ;;  %v290_v34 = vmul.f32 %v501_v30, %v280_v19 }
 0x182   : > { %v303_v35 = vmul.f32 %v296_v28, %v289_v33  ;;  %v304_v36 = vmul.f32 %v300_v29, %v290_v34 }
 0x184   : > { %v317_v37 = vadd.f32 %v310_v31, %v303_v35  ;;  %v318_v38 = vadd.f32 %v314_v32, %v304_v36 }
 0x186   : > { %v441_v39 = vpack.c.bf16 %v318_v38, %v317_v37 }
 0x188   : > { %327 = vst [vmem:[%s253_s17] sm:$0xff] %v441_v39 }
 0x189   : > { %569 = shalt.err (!%p566_p3)
}
 0x18a   : > { %s570_s24 = scalar_lea.hbm %s341_s9, 128  ;;  %s574_s6 = scalar_lea.hbm %s838_s5, 1024 }
 0x18b   : > { %p571_p11 = scmp.ne.s32.totalorder %s341_s9, %s570_s24  ;;  %p575_p6 = scmp.lt.s32.totalorder %s341_s9, %s838_s5 }
 0x18c   : > { %p576_p4 = scmp.lt.s32.totalorder %s574_s6, %s570_s24 }
 0x18d   : > { %p572_p5 = pnand %p571_p11, %p855_p10 }
 0x18e   : > { %p577_p8 = por %p576_p4, %p575_p6 }
 0x18f   : > { %p573_p7 = pneg %p572_p5 }
 0x191   : > { %p578_p13 = pnand %p577_p8, %p573_p7 }
 0x193   : > { %581 = shalt.err (!%p578_p13)
}
 0x194   : > { %449 = dma.vmem_to_hbm [thread:$0]  (%p855_p10), %s344_s14, 128, %s341_s9, %s329_s10  }
 0x195 PF: > { %p466_p12 = scmp.ge.s32.totalorder %s624_s21, 2  ;;  %s355_s15 = sand.u32 1, %s612_s18  }
 0x196   : > { %p856_p9 = scmp.ne.s32.totalorder %s844_s25, 0  ;;  %s356_s17 = scalar_lea.sflag [#allocation4], %s355_s15 }
 0x198   : > { %p460_p1 = pnand %p466_p12, %p856_p9 }
 0x19a   : > { %p461_p2 = pneg %p460_p1 }
 0x19c   : > { %607 = dma.done.wait (%p461_p2), %s356_s17, 128  }
 0x19d   : > { %609 = vsyncadd (%p461_p2), %s356_s17, 4294967168  ;;  %p19_p0 = scmp.ge.s32.totalorder %s706_s29, 10   ;;  %s857_s18 = smov %s616_s19 }
 0x19e   : > { %s858_s19 = smov %s620_s20  ;;  %s859_s20 = smov %s733_s12 }
 0x19f   : > { %s860_s21 = smov %s706_s29  ;;  %21 = sbr.rel (!%p19_p0) target bundleno = 6 (0x6), region = 89 }
 0x1a4   :  { %361 = vsyncpa [#allocation3], 1 }
 0x1a5   :  { %363 = vsyncpa [#allocation3 + $0x1], 1 }
 0x1a6   :  { %364 = vsyncpa [#allocation6], 1 }
 0x1a7   :  { %365 = vsyncpa [#allocation4], 1 }
 0x1a8   :  { %367 = vsyncpa [#allocation4 + $0x1], 1 }

</bundles_post_ra>
